<compile_context>
chip_gen: v7x
topology: tpu7x:2x2x1
jax: 0.10.0
libtpu: 0.0.40
codegen_flags: <defaults>
</compile_context>

<pallas_src>
import functools

import jax
import jax.numpy as jnp
import numpy as np
from jax.experimental import pallas as pl
from jax.experimental.pallas import tpu as pltpu


def _int_pow(x, n):
    """x**n for a small positive integer n via repeated squaring (VPU only)."""
    result = None
    cur = x
    while n:
        if n & 1:
            result = cur if result is None else result * cur
        n >>= 1
        if n:
            cur = cur * cur
    return result


def _is_small_int(g):
    return float(g).is_integer() and 0.0 < float(g) <= 32.0


def _row_losses(x_ref, t_ref, *, gamma_pos, gamma_neg, eps, num_classes,
                valid_batch, tile_b):
    """Per-row ASL losses for one (TB, C) logits tile; ragged-tail rows -> 0."""
    i = pl.program_id(0)

    x = x_ref[...].astype(jnp.float32)                          # (TB, C)
    tgt = t_ref[...]                                            # (TB, 1) int32

    # ---- stable log-softmax; exp(z) is the only full-width transcendental ----
    m = jnp.max(x, axis=-1, keepdims=True)                      # (TB, 1)
    z = x - m
    ez = jnp.exp(z)                                             # (TB, C)  EUP
    sum_ez = jnp.sum(ez, axis=-1, keepdims=True)                # (TB, 1)
    log_z = jnp.log(sum_ez)                                     # O(TB)
    log_preds = z - log_z                                       # (TB, C), <= 0

    # ---- target membership & target-lane log-prob (O(TB) column) ----
    col = jax.lax.broadcasted_iota(jnp.int32, x.shape, 1)       # (TB, C)
    is_target = col == tgt
    lp_t = jnp.sum(jnp.where(is_target, log_preds, 0.0),
                   axis=-1, keepdims=True)                      # (TB, 1)
    p_t = jnp.exp(lp_t)                                         # O(TB), <= 1

    a = float(eps) / float(num_classes)                         # smoothing floor
    b = 1.0 - float(eps) + a                                    # target weight

    # ---- target-lane focusing weight (1 - p_t)**gamma_pos, O(TB) ----
    if gamma_pos == 0.0:
        w_pos = jnp.ones_like(p_t)                              # pow(x, 0) == 1
    elif _is_small_int(gamma_pos):
        w_pos = _int_pow(1.0 - p_t, int(gamma_pos))
    else:
        # exp(g*log(1-p_t)); p_t == 1 -> exp(-inf) = 0 == torch.pow(0, g)
        w_pos = jnp.exp(gamma_pos * jnp.log(1.0 - p_t))

    if a == 0.0:
        # eps == 0: only the target lane contributes.
        loss_row = -(b * w_pos) * lp_t                          # (TB, 1)
    else:
        # ---- anti-target weight p**gamma_neg, without a second exp ----
        if gamma_neg == 0.0:
            w_neg = jnp.ones_like(ez)
            w_neg_t = jnp.ones_like(p_t)
        elif _is_small_int(gamma_neg):
            inv_sum = 1.0 / sum_ez                              # O(TB) divide
            p = ez * inv_sum                                    # (TB, C)  VPU
            w_neg = _int_pow(p, int(gamma_neg))                 # VPU squarings
            w_neg_t = _int_pow(p_t, int(gamma_neg))             # O(TB)
        else:
            # TODO(synk): run this exp in bf16 on v6e/v7x (~2x EUP rate).
            w_neg = jnp.exp(gamma_neg * log_preds)              # (TB, C) 2nd exp
            w_neg_t = jnp.exp(gamma_neg * lp_t)                 # O(TB)

        # folded label smoothing (no full-width tc / asym_w selects):
        s = jnp.sum(w_neg * log_preds, axis=-1, keepdims=True)  # (TB, 1)
        loss_row = -(a * s + (b * w_pos - a * w_neg_t) * lp_t)  # (TB, 1)

    # ---- discard ragged-tail rows (select, NOT multiply: tail may be NaN) ----
    if valid_batch % tile_b != 0:
        row = i * tile_b + jax.lax.broadcasted_iota(jnp.int32, loss_row.shape, 0)
        loss_row = jnp.where(row < valid_batch, loss_row, 0.0)
    return loss_row                                             # (TB, 1)


def _asl_mean_kernel(x_ref, t_ref, part_ref, **kw):
    loss_row = _row_losses(x_ref, t_ref, **kw)
    # lane-dense (1, 1, 128) tile partial sum (same value in every lane)
    part_ref[...] = jnp.broadcast_to(jnp.sum(loss_row), part_ref.shape)


def _asl_rows_kernel(x_ref, t_ref, row_ref, **kw):
    row_ref[...] = _row_losses(x_ref, t_ref, **kw)


def _vmem_capacity_bytes():
    try:
        return int(pltpu.get_tpu_info().vmem_capacity_bytes)
    except Exception:
        return 64 << 20                                         # safe default


def _pick_tile(batch, num_classes, block_bytes):
    """Batch-tile rows: ~block_bytes of f32 per (TB, C) block, multiple of 8."""
    row_bytes = max(1, num_classes) * 4
    tb = max(8, (block_bytes // row_bytes) // 8 * 8)
    b8 = ((batch + 7) // 8) * 8                                 # never exceed batch
    return min(tb, b8)


def asymmetric_loss_single_label(inputs, target, *, gamma_pos=1.0,
                                 gamma_neg=4.0, eps=0.1, reduction="mean",
                                 tile_b=None):
    """Pallas implementation of AsymmetricLossSingleLabel.forward."""
    assert inputs.ndim == 2, "expected (batch, num_classes) logits"
    B, C = inputs.shape

    big_vmem = _vmem_capacity_bytes() > (64 << 20)              # v5e/v6e vs v7x
    block_bytes = (6 << 20) if big_vmem else (4 << 20)
    tb = _pick_tile(B, C, block_bytes) if tile_b is None else int(tile_b)
    num_tiles = -(-B // tb)

    t2 = target.astype(jnp.int32).reshape(B, 1)

    kw = dict(gamma_pos=float(gamma_pos), gamma_neg=float(gamma_neg),
              eps=float(eps), num_classes=C, valid_batch=B, tile_b=tb)

    # triple-buffer the logits DMA on multi-tile grids (single tile: default)
    if num_tiles > 1:
        x_spec = pl.BlockSpec((tb, C), lambda i: (i, 0),
                              pipeline_mode=pl.Buffered(3))
    else:
        x_spec = pl.BlockSpec((tb, C), lambda i: (i, 0))
    in_specs = [x_spec, pl.BlockSpec((tb, 1), lambda i: (i, 0))]

    compiler_params = pltpu.CompilerParams(
        dimension_semantics=("parallel",),
        vmem_limit_bytes=(64 << 20) if big_vmem else (48 << 20))

    if reduction == "mean":
        partials = pl.pallas_call(
            functools.partial(_asl_mean_kernel, **kw),
            out_shape=jax.ShapeDtypeStruct((num_tiles, 1, 128), jnp.float32),
            grid_spec=pltpu.PrefetchScalarGridSpec(
                num_scalar_prefetch=0, grid=(num_tiles,),
                in_specs=in_specs,
                out_specs=pl.BlockSpec((1, 1, 128), lambda i: (i, 0, 0))),
            compiler_params=compiler_params,
        )(inputs, t2)
        return jnp.sum(partials[:, 0, 0]) / B

    # reduction != 'mean' -> per-sample losses (the PyTorch module only
    # reduces when reduction == 'mean').
    rows = pl.pallas_call(
        functools.partial(_asl_rows_kernel, **kw),
        out_shape=jax.ShapeDtypeStruct((num_tiles * tb, 1), jnp.float32),
        grid_spec=pltpu.PrefetchScalarGridSpec(
            num_scalar_prefetch=0, grid=(num_tiles,),
            in_specs=in_specs,
            out_specs=pl.BlockSpec((tb, 1), lambda i: (i, 0))),
        compiler_params=compiler_params,
    )(inputs, t2)
    return rows[:B, 0]


def _reference(inputs, target, gamma_pos=1.0, gamma_neg=4.0, eps=0.1,
               reduction="mean"):
    """Pure-JAX reference mirroring the PyTorch forward exactly."""
    C = inputs.shape[-1]
    log_preds = jax.nn.log_softmax(inputs.astype(jnp.float32), axis=-1)
    targets = jax.nn.one_hot(target, C, dtype=jnp.float32)
    anti = 1.0 - targets
    p = jnp.exp(log_preds)
    xs_pos = p * targets
    xs_neg = (1.0 - p) * anti
    w = jnp.power(1.0 - xs_pos - xs_neg,
                  gamma_pos * targets + gamma_neg * anti)
    lp = log_preds * w
    tc = targets * (1.0 - eps) + eps / C
    loss = -(tc * lp).sum(-1)
    if reduction == "mean":
        loss = loss.mean()
    return loss


if __name__ == "__main__":
    key = jax.random.PRNGKey(0)
    ks = jax.random.split(key, 10)

    def check(logits, labels, **kwargs):
        got = jax.block_until_ready(
            asymmetric_loss_single_label(logits, labels, **kwargs))
        ref_kwargs = {k: v for k, v in kwargs.items() if k != "tile_b"}
        want = _reference(logits, labels, **ref_kwargs)
        np.testing.assert_allclose(np.asarray(got), np.asarray(want),
                                   rtol=2e-5, atol=2e-5)

    C = 32
    # 1) default path: B=8, single tile, reduction='mean'
    logits = jax.random.normal(ks[0], (8, C), dtype=jnp.float32)
    labels = jax.random.randint(ks[1], (8,), 0, C, dtype=jnp.int32)
    check(logits, labels)

    # 2) multi-tile grid (3 tiles), parallel partial sums, Buffered(3) path
    logits = jax.random.normal(ks[2], (24, C), dtype=jnp.float32)
    labels = jax.random.randint(ks[3], (24,), 0, C, dtype=jnp.int32)
    check(logits, labels, tile_b=8)

    # 3) ragged last block with NO wrapper pad: B=20, tile_b=8, 'mean'
    logits = jax.random.normal(ks[4], (20, C), dtype=jnp.float32)
    labels = jax.random.randint(ks[5], (20,), 0, C, dtype=jnp.int32)
    check(logits, labels, tile_b=8)

    # 4) reduction='none' + ragged single block (B=12 -> one 16-row block)
    logits = jax.random.normal(ks[6], (12, C), dtype=jnp.float32)
    labels = jax.random.randint(ks[7], (12,), 0, C, dtype=jnp.int32)
    check(logits, labels, reduction="none")

    # 5) non-integer gamma_neg (exp fallback), integer gamma_pos=2, eps=0.2
    logits = jax.random.normal(ks[8], (16, C), dtype=jnp.float32)
    labels = jax.random.randint(ks[9], (16,), 0, C, dtype=jnp.int32)
    check(logits, labels, gamma_pos=2.0, gamma_neg=2.5, eps=0.2)

    # 6) eps=0 path (target-lane-only loss), reduction='none'
    check(logits, labels, gamma_pos=1.0, gamma_neg=4.0, eps=0.0,
          reduction="none")

    print("KERNEL_OK")
</pallas_src>

<mosaic_0001>
module attributes {stable_mosaic.version = 11 : i64} {
  func.func @_asl_mean_kernel(%arg0: i32, %arg1: memref<8x32xf32, #tpu.memory_space<vmem>>, %arg2: memref<8x1xi32, #tpu.memory_space<vmem>>, %arg3: memref<1x1x128xf32, #tpu.memory_space<vmem>>) attributes {dimension_semantics = [#tpu.dimension_semantics<parallel>], iteration_bounds = array<i64: 1>, scalar_prefetch = 0 : i64, scratch_operands = 0 : i64, tpu.core_type = #tpu.core_type<tc>, window_params = [{transform_indices = @transform_0, window_bounds = array<i64: 8, 32>}, {transform_indices = @transform_1, window_bounds = array<i64: 8, 1>}, {transform_indices = @transform_2, window_bounds = array<i64: 1, 1, 128>}]} {
    %c0 = arith.constant 0 : index
    %c0_0 = arith.constant 0 : index
    %0 = vector.load %arg1[%c0, %c0_0] : memref<8x32xf32, #tpu.memory_space<vmem>>, vector<8x32xf32>
    %c0_1 = arith.constant 0 : index
    %c0_2 = arith.constant 0 : index
    %1 = vector.load %arg2[%c0_1, %c0_2] : memref<8x1xi32, #tpu.memory_space<vmem>>, vector<8x1xi32>
    %cst = arith.constant dense<0xFF800000> : vector<8xf32>
    %2 = vector.multi_reduction <maximumf>, %0, %cst [1] : vector<8x32xf32> to vector<8xf32>
    %3 = vector.shape_cast %2 : vector<8xf32> to vector<8x1xf32>
    %4 = vector.broadcast %3 : vector<8x1xf32> to vector<8x32xf32>
    %5 = arith.subf %0, %4 : vector<8x32xf32>
    %6 = math.exp %5 : vector<8x32xf32>
    %cst_3 = arith.constant dense<0.000000e+00> : vector<8xf32>
    %7 = vector.multi_reduction <add>, %6, %cst_3 [1] : vector<8x32xf32> to vector<8xf32>
    %8 = vector.shape_cast %7 : vector<8xf32> to vector<8x1xf32>
    %9 = math.log %8 : vector<8x1xf32>
    %10 = vector.broadcast %9 : vector<8x1xf32> to vector<8x32xf32>
    %11 = arith.subf %5, %10 : vector<8x32xf32>
    %12 = tpu.iota {dimensions = array<i32: 1>} : vector<8x32xi32>
    %13 = vector.broadcast %1 : vector<8x1xi32> to vector<8x32xi32>
    %14 = arith.cmpi eq, %12, %13 : vector<8x32xi32>
    %cst_4 = arith.constant 0.000000e+00 : f32
    %15 = vector.broadcast %cst_4 : f32 to vector<8x32xf32>
    %16 = arith.select %14, %11, %15 : vector<8x32xi1>, vector<8x32xf32>
    %cst_5 = arith.constant dense<0.000000e+00> : vector<8xf32>
    %17 = vector.multi_reduction <add>, %16, %cst_5 [1] : vector<8x32xf32> to vector<8xf32>
    %18 = vector.shape_cast %17 : vector<8xf32> to vector<8x1xf32>
    %19 = math.exp %18 : vector<8x1xf32>
    %cst_6 = arith.constant 1.000000e+00 : f32
    %20 = vector.broadcast %cst_6 : f32 to vector<8x1xf32>
    %21 = arith.subf %20, %19 : vector<8x1xf32>
    %cst_7 = arith.constant 1.000000e+00 : f32
    %22 = vector.broadcast %cst_7 : f32 to vector<8x1xf32>
    %23 = arith.divf %22, %8 : vector<8x1xf32>
    %24 = vector.broadcast %23 : vector<8x1xf32> to vector<8x32xf32>
    %25 = arith.mulf %6, %24 : vector<8x32xf32>
    %26 = arith.mulf %25, %25 : vector<8x32xf32>
    %27 = arith.mulf %26, %26 : vector<8x32xf32>
    %28 = arith.mulf %19, %19 : vector<8x1xf32>
    %29 = arith.mulf %28, %28 : vector<8x1xf32>
    %30 = arith.mulf %27, %11 : vector<8x32xf32>
    %cst_8 = arith.constant dense<0.000000e+00> : vector<8xf32>
    %31 = vector.multi_reduction <add>, %30, %cst_8 [1] : vector<8x32xf32> to vector<8xf32>
    %32 = vector.shape_cast %31 : vector<8xf32> to vector<8x1xf32>
    %cst_9 = arith.constant 3.125000e-03 : f32
    %33 = vector.broadcast %cst_9 : f32 to vector<8x1xf32>
    %34 = arith.mulf %33, %32 : vector<8x1xf32>
    %cst_10 = arith.constant 0.903124988 : f32
    %35 = vector.broadcast %cst_10 : f32 to vector<8x1xf32>
    %36 = arith.mulf %35, %21 : vector<8x1xf32>
    %cst_11 = arith.constant 3.125000e-03 : f32
    %37 = vector.broadcast %cst_11 : f32 to vector<8x1xf32>
    %38 = arith.mulf %37, %29 : vector<8x1xf32>
    %39 = arith.subf %36, %38 : vector<8x1xf32>
    %40 = arith.mulf %39, %18 : vector<8x1xf32>
    %41 = arith.addf %34, %40 : vector<8x1xf32>
    %cst_12 = arith.constant 0.000000e+00 : f32
    %42 = vector.broadcast %cst_12 : f32 to vector<8x1xf32>
    %43 = arith.subf %42, %41 : vector<8x1xf32>
    %44 = vector.shape_cast %43 : vector<8x1xf32> to vector<1x8x1xf32>
    %cst_13 = arith.constant dense<0.000000e+00> : vector<1xf32>
    %45 = vector.multi_reduction <add>, %44, %cst_13 [1, 2] : vector<1x8x1xf32> to vector<1xf32>
    %46 = vector.shape_cast %45 : vector<1xf32> to vector<1x1x1xf32>
    %47 = vector.extract %46[0, 0, 0] : f32 from vector<1x1x1xf32>
    %48 = vector.broadcast %47 : f32 to vector<1x1x128xf32>
    %c0_14 = arith.constant 0 : index
    %c0_15 = arith.constant 0 : index
    %c0_16 = arith.constant 0 : index
    %49 = vector.load %arg3[%c0_14, %c0_15, %c0_16] : memref<1x1x128xf32, #tpu.memory_space<vmem>>, vector<1x1x128xf32>
    tpu.vector_store %arg3[%c0_14, %c0_15, %c0_16], %48 {strides = array<i32>} : memref<1x1x128xf32, #tpu.memory_space<vmem>>, vector<1x1x128xf32>,
    return
  }
  func.func @transform_0(%arg0: i32) -> (i32, i32) {
    %c0_i32 = arith.constant 0 : i32
    %c0_i32_0 = arith.constant 0 : i32
    return %arg0, %c0_i32 : i32, i32
  }
  func.func @transform_1(%arg0: i32) -> (i32, i32) {
    %c0_i32 = arith.constant 0 : i32
    %c0_i32_0 = arith.constant 0 : i32
    return %arg0, %c0_i32 : i32, i32
  }
  func.func @transform_2(%arg0: i32) -> (i32, i32, i32) {
    %c0_i32 = arith.constant 0 : i32
    %c0_i32_0 = arith.constant 0 : i32
    %c0_i32_1 = arith.constant 0 : i32
    return %arg0, %c0_i32, %c0_i32_0 : i32, i32, i32
  }
}

</mosaic_0001>

<bundles_post_ra>
// kernel: tpu_custom_call.1
= control target key start
LH: loop header
LB: loop body
LE: loop exit
PB: predicated region body
PF: predicated region fallthrough
CT: control target
= control target key end

     0   :  { %vm14_vm0 = vcmask 261120   ;;  %s162_s0 = inlined_call_operand.vmem [shape: f32[8,32], index: 0, kind: input, shape index: {}]   ;;  %s163_s1 = inlined_call_operand.vmem [shape: s32[8,1], index: 1, kind: input, shape index: {}]   ;;  %s164_s2 = inlined_call_operand.hbm [shape: f32[1,1,128], index: 2, kind: output, shape index: {}]  }
   0x1   :  { %v12_v0 = vld [vmem:[%s162_s0] sm:$0xff] }
   0x2   :  { %7 = vsyncpa [#allocation3], 0  ;;  %v15_v1 = vsel %vm14_vm0, %v12_v0, -inf  ;;  %v13_v2 = vld [vmem:[%s163_s1] sm:$0xff]  ;;  %v123_v3 = vmov 0   ;;  %v27_v10 = vlaneseq  ;;  %vm58_vm2 = vcmask 7168  }
   0x3   :  { %16 = vmax.xlane.f32.xlu0 %v15_v1  ;;  %89 = vset.pattern.permute.xlu1 %v123_v3  ;;  %s124_s0 = smov [#allocation2]  }
   0x4   :  { %90 = vset.pattern.permute.xlu0 %v123_v3  ;;  %30 = vperm.xlu1 %89, %v13_v2   ;;  %v28_v11 = vand.u32 127, %v27_v10  ;;  %s77_s1 = sshll.u32 %s124_s0, 4  ;;  %s78_s1 = int_to_ptr.vmem [resolvable:$true] %s77_s1 }
   0x5   :  { %s99_s14 = scalar_lea.vmem %s78_s1, 16  ;;  %s103_s15 = scalar_lea.vmem %s78_s1, 32 }
   0x6   :  { %p100_p0 = scmp.ne.s32.totalorder %s78_s1, %s99_s14  ;;  %p104_p1 = scmp.lt.s32.totalorder %s78_s1, %s78_s1 }
   0x7   :  { %p105_p2 = scmp.lt.s32.totalorder %s103_s15, %s99_s14 }
   0x9   :  { %p106_p3 = por %p105_p2, %p104_p1 }
   0xb   :  { %p107_p4 = pnand %p106_p3, %p100_p0 }
  0x83   :  { %v31_v12 = vpop.permute.xlu1 %30 }
  0x84   :  { %vm32_vm1 = vcmp.eq.s32.totalorder %v28_v11, %v31_v12 }
  0x90   :  { %v17_v4 = vpop.xlane.xlu0 %16 }
  0x91   :  { %v18_v5 = vsub.f32 %v12_v0, %v17_v4 }
  0x93   :  { %v19_v6 = vmul.f32 1.442695, %v18_v5 }
  0x95   :  { %91 = vpow2.f32 %v19_v6 }
  0x9f   :  { %v92_v7 = vpop.eup %91 }
  0xa0   :  { %v21_v8 = vsel %vm14_vm0, %v92_v7, 0.0 }
  0xa1   :  { %22 = vadd.xlane.f32.xlu0 %v21_v8 }
 0x12e   :  { %v23_v9 = vpop.xlane.xlu0 %22 }
 0x12f   :  { %93 = vlog2.f32 %v23_v9 }
 0x130   :  { %95 = vrcp.f32 %v23_v9 }
 0x139   :  { %v94_v13 = vpop.eup %93 }
 0x13a   :  { %v96_v14 = vpop.eup %95  ;;  %v25_v15 = vmul.f32 0.6931472, %v94_v13 }
 0x13b   :  { %v42_v16 = vmul.f32 %v96_v14, %v92_v7 }
 0x13c   :  { %v26_v17 = vsub.f32 %v18_v5, %v25_v15 }
 0x13d   :  { %v43_v18 = vmul.f32 %v42_v16, %v42_v16 }
 0x13e   :  { %v33_v19 = vsel %vm32_vm1, %v26_v17, 0.0 }
 0x13f   :  { %v34_v20 = vsel %vm14_vm0, %v33_v19, 0.0  ;;  %v44_v21 = vmul.f32 %v43_v18, %v43_v18 }
 0x140   :  { %35 = vadd.xlane.f32.xlu1 %v34_v20 }
 0x141   :  { %v47_v22 = vmul.f32 %v44_v21, %v26_v17 }
 0x143   :  { %v48_v23 = vsel %vm14_vm0, %v47_v22, 0.0 }
 0x144   :  { %49 = vadd.xlane.f32.xlu0 %v48_v23 }
 0x1cd   :  { %v36_v24 = vpop.xlane.xlu1 %35 }
 0x1ce   :  { %v37_v25 = vmul.f32 1.442695, %v36_v24 }
 0x1d0   :  { %97 = vpow2.f32 %v37_v25 }
 0x1d1   :  { %v50_v32 = vpop.xlane.xlu0 %49 }
 0x1d2   :  { %v51_v35 = vmul.f32 0.003125, %v50_v32 }
 0x1da   :  { %v98_v26 = vpop.eup %97 }
 0x1db   :  { %v39_v27 = vsub.f32 1.0, %v98_v26  ;;  %v45_v28 = vmul.f32 %v98_v26, %v98_v26 }
 0x1dd   :  { %v46_v29 = vmul.f32 %v45_v28, %v45_v28  ;;  %v52_v30 = vmul.f32 0.903125, %v39_v27 }
 0x1df   :  { %v53_v31 = vmul.f32 0.003125, %v46_v29 }
 0x1e1   :  { %v54_v33 = vsub.f32 %v52_v30, %v53_v31 }
 0x1e3   :  { %v55_v34 = vmul.f32 %v54_v33, %v36_v24 }
 0x1e5   :  { %v56_v36 = vadd.f32 %v55_v34, %v51_v35 }
 0x1e7   :  { %v57_v37 = vsub.f32 0.0, %v56_v36 }
 0x1e9   :  { %v59_v38 = vsel %vm58_vm2, %v57_v37, 0.0 }
 0x1ea   :  { %60 = vadd.xlane.f32.xlu0 %v59_v38 }
 0x277   :  { %v61_v39 = vpop.xlane.xlu0 %60 }
 0x278   :  { %v62_v40 = vrot.slane %v61_v39, 4 }
 0x27a   :  { %v63_v41 = vadd.f32 %v62_v40, %v61_v39 }
 0x27c   :  { %v64_v42 = vrot.slane %v63_v41, 2 }
 0x27e   :  { %v65_v43 = vadd.f32 %v64_v42, %v63_v41 }
 0x280   :  { %v66_v44 = vrot.slane %v65_v43, 1 }
 0x282   :  { %v67_v45 = vadd.f32 %v66_v44, %v65_v43 }
 0x284   :  { %85 = vpush %v67_v45 }
 0x2b5   :  { %s86_s13 = spop %85 }
 0x2b6   :  { %v69_v46 = vstv %s86_s13 }
 0x2b7   :  { %70 = vst [vmem:[#allocation2] sm:$0x1] %v69_v46 }
 0x2b8   :  { %110 = shalt.err (!%p107_p4)
}
 0x2b9   :  { %s111_s18 = scalar_lea.hbm %s164_s2, 16 }
 0x2ba   :  { %p112_p5 = scmp.ne.s32.totalorder %s164_s2, %s111_s18  ;;  %p115_p6 = scmp.lt.u32.totalorder %s111_s18, %s164_s2 }
 0x2bc   :  { %p117_p7 = pnand %p115_p6, %p112_p5 }
 0x2be   :  { %120 = shalt.err (!%p117_p7)
}
 0x2bf   :  { %80 = dma.vmem_to_hbm [thread:$0]  %s78_s1, 16, %s164_s2, [#allocation3]  }
 0x2c0   :  { %121 = dma.done.wait [#allocation3], 16  }
 0x2c1   :  { %122 = vsyncadd [#allocation3], 4294967280 }
 0x2c2   :  { %84 = vsyncpa [#allocation3], 1 }

</bundles_post_ra>
